<compile_context>
chip_gen: v7x
topology: tpu7x:2x2x1
jax: 0.10.0
libtpu: 0.0.40
codegen_flags: <defaults>
</compile_context>

<pallas_src>
import jax
import jax.numpy as jnp
from jax import lax
from jax.experimental import pallas as pl
from jax.experimental.pallas import tpu as pltpu


_INV_SQRT2 = 0.7071067811865476


def _round_up(a: int, b: int) -> int:
    return (a + b - 1) // b * b


# ----------------------------------------------------------------------------- kernels

def _ffn_kernel_resident(x_ref, w1_ref, w2_ref, o_ref):
    """One row tile of GELU(x @ W1) @ W2 with both weights fully VMEM-resident."""
    h = jnp.dot(x_ref[...], w1_ref[...], preferred_element_type=jnp.float32)
    half_h = 0.5 * h
    h = half_h + half_h * lax.erf(h * _INV_SQRT2)          # exact GELU, f32
    o_ref[...] = jnp.dot(h.astype(w2_ref.dtype), w2_ref[...],
                         preferred_element_type=jnp.float32).astype(o_ref.dtype)


def _ffn_kernel_chunked(x_ref, w1_ref, w2_ref, o_ref, acc_ref):
    """(row tile i, hidden chunk k) step; partial products accumulated in f32."""
    k = pl.program_id(1)

    h = jnp.dot(x_ref[...], w1_ref[...], preferred_element_type=jnp.float32)
    half_h = 0.5 * h
    h = half_h + half_h * lax.erf(h * _INV_SQRT2)
    part = jnp.dot(h.astype(w2_ref.dtype), w2_ref[...],
                   preferred_element_type=jnp.float32)

    @pl.when(k == 0)
    def _():                      # first chunk: plain store, no zero-init round trip
        acc_ref[...] = part

    @pl.when(k > 0)
    def _():
        acc_ref[...] += part

    @pl.when(k == pl.num_programs(1) - 1)
    def _():
        o_ref[...] = acc_ref[...].astype(o_ref.dtype)


# ----------------------------------------------------------------------------- sizing

def _vmem_budget_and_limit():
    cap = None
    try:
        cap = getattr(pltpu.get_tpu_info(), "vmem_capacity_bytes", None)
    except Exception:
        cap = None
    if not cap:
        cap = 64 * 1024 * 1024            # conservative default: v7x per-TensorCore
    budget = int(cap * 0.625)             # ~40 MiB on 64 MiB parts, ~80 MiB on 128 MiB
    limit = int(cap * 0.78)               # ~50 MiB            , ~100 MiB
    return budget, limit


def _prefers_256_tiles():
    # v6e/v7x MXU is 2x256x256 -> prefer 256-aligned tiles; v5e (4x128x128) keeps 128.
    try:
        kind = jax.devices()[0].device_kind.lower()
    except Exception:
        return True
    return not any(v in kind for v in ("v2", "v3", "v4", "v5"))


def _choose_tiles(M, dim_p, hidden_p, x_item, w_item, out_item, budget, prefer_256):
    """Pick (tm, tk).  Preference order:
       1) tk == hidden_p: weights fully resident (fetched once for the whole grid),
          with the largest row tile that still fits;
       2) otherwise chunk the hidden dim: largest tm first (arithmetic intensity
          scales with tm once weights are re-streamed per row tile), then largest tk.
    """
    max_tm = 1024 if budget >= 60 * 1024 * 1024 else 512
    tm_cap = max(8, _round_up(min(M, max_tm), 8))
    tm_cands = sorted({tm_cap} | {t for t in (1024, 512, 256, 128, 64, 32, 16, 8)
                                  if t <= tm_cap}, reverse=True)

    tk_cands = [d for d in range(hidden_p, 0, -128) if hidden_p % d == 0]
    if prefer_256:
        tk_cands = ([d for d in tk_cands if d % 256 == 0]
                    + [d for d in tk_cands if d % 256 != 0])

    def bytes_resident(tm):
        return (2 * tm * dim_p * x_item              # x tile, double-buffered
                + 2 * tm * dim_p * out_item          # out tile, double-buffered
                + 2 * 2 * dim_p * hidden_p * w_item  # W1+W2 (conservatively 2 buffers)
                + tm * hidden_p * 4)                 # f32 GELU intermediate

    def bytes_chunked(tm, tk):
        return (2 * tm * dim_p * x_item
                + 2 * tm * dim_p * out_item
                + 2 * dim_p * tk * w_item            # W1 chunk, double-buffered
                + 2 * tk * dim_p * w_item            # W2 chunk, double-buffered
                + tm * dim_p * 4                     # f32 accumulator scratch
                + tm * tk * 4)                       # f32 GELU intermediate

    # 1) Weights fully resident, as long as a reasonable row tile still fits.
    for tm in tm_cands:
        if tm >= min(128, tm_cap) and bytes_resident(tm) <= budget:
            return tm, hidden_p
    # 2) Chunk the hidden dim (tk == hidden_p with a small tm remains a candidate).
    for tm in tm_cands:
        for tk in tk_cands:
            if bytes_chunked(tm, tk) <= budget:
                return tm, tk
    return tm_cands[-1], tk_cands[-1]


# ----------------------------------------------------------------------------- wrapper

def feed_forward(x, w1, w2, *, tm=None, tk=None, mxu_dtype=None,
                 vmem_budget_bytes=None, vmem_limit_bytes=None):
    """y = GELU(x @ w1) @ w2 fused in one pallas_call.

    x: (B, S, dim); w1: (dim, hidden); w2: (hidden, dim) -- (in, out)-layout
    weights (i.e. transposed nn.Linear weights), bias=False, dropout=0.
    mxu_dtype: e.g. jnp.bfloat16 to store/stream bf16 operands and feed the MXU
    bf16 (recommended on all generations for throughput); accumulation stays
    f32, expect ~1e-2 activation error vs the pure-f32 path.
    """
    B, S, dim = x.shape
    d_in, hidden = w1.shape
    assert d_in == dim and w2.shape == (hidden, dim)

    M = B * S
    dim_p = _round_up(dim, 128)           # lane-dense last dims (unmasked stores)
    hidden_p = _round_up(hidden, 128)

    out_dtype = x.dtype
    compute_dtype = jnp.dtype(mxu_dtype) if mxu_dtype is not None else jnp.dtype(x.dtype)
    x_item = compute_dtype.itemsize
    w_item = compute_dtype.itemsize
    out_item = jnp.dtype(out_dtype).itemsize

    auto_budget, auto_limit = _vmem_budget_and_limit()
    if vmem_budget_bytes is None:
        vmem_budget_bytes = auto_budget
    if vmem_limit_bytes is None:
        vmem_limit_bytes = max(auto_limit, int(vmem_budget_bytes * 1.2))

    if tm is None or tk is None:
        tm_a, tk_a = _choose_tiles(M, dim_p, hidden_p, x_item, w_item, out_item,
                                   vmem_budget_bytes, _prefers_256_tiles())
        if tm is None:
            tm = tm_a
        if tk is None:
            tk = tk_a
    assert tm % 8 == 0 and tk % 128 == 0 and hidden_p % tk == 0
    kt = hidden_p // tk

    Mp = _round_up(M, tm)                 # pad rows instead of forcing tiny tm
    gm = Mp // tm

    # Host-side dtype cast (halves DMA + VMEM when mxu_dtype=bf16), then pad.
    # Zero padding is exact: padded x columns hit zero W1 rows, padded hidden
    # columns give GELU(0)=0 which hits zero W2 rows, padded output rows/cols
    # are sliced away below.
    x2 = x.reshape(M, dim).astype(compute_dtype)
    w1c = w1.astype(compute_dtype)
    w2c = w2.astype(compute_dtype)
    if (Mp, dim_p) != (M, dim):
        x2 = jnp.pad(x2, ((0, Mp - M), (0, dim_p - dim)))
    if (dim_p, hidden_p) != (dim, hidden):
        w1c = jnp.pad(w1c, ((0, dim_p - dim), (0, hidden_p - hidden)))
        w2c = jnp.pad(w2c, ((0, hidden_p - hidden), (0, dim_p - dim)))

    # Advisory cost: weights are fetched once when resident, gm times when chunked.
    weight_bytes = 2 * dim_p * hidden_p * w_item * (1 if kt == 1 else gm)
    cost = pl.CostEstimate(
        flops=4 * Mp * dim_p * hidden_p,                 # two matmuls
        transcendentals=Mp * hidden_p,                   # erf
        bytes_accessed=Mp * dim_p * (x_item + out_item) + weight_bytes)

    if kt == 1:
        # Both weights resident across the whole grid; single grid axis over rows.
        # TODO(synk): if an xprof profile on v7x shows single-TensorCore occupancy,
        # switch axis 0 to pltpu.CORE_PARALLEL (plain "parallel" kept for portability).
        def build(single_buffer_weights):
            wkw = {"pipeline_mode": pl.Buffered(1)} if single_buffer_weights else {}
            return pl.pallas_call(
                _ffn_kernel_resident,
                out_shape=jax.ShapeDtypeStruct((Mp, dim_p), out_dtype),
                grid_spec=pltpu.PrefetchScalarGridSpec(
                    num_scalar_prefetch=0,
                    grid=(gm,),
                    in_specs=[
                        pl.BlockSpec((tm, dim_p), lambda i: (i, 0)),        # x rows
                        pl.BlockSpec((dim_p, hidden_p), lambda i: (0, 0), **wkw),
                        pl.BlockSpec((hidden_p, dim_p), lambda i: (0, 0), **wkw),
                    ],
                    out_specs=pl.BlockSpec((tm, dim_p), lambda i: (i, 0)),
                ),
                compiler_params=pltpu.CompilerParams(
                    dimension_semantics=("parallel",),
                    vmem_limit_bytes=vmem_limit_bytes),
                cost_estimate=cost,
            )
        try:
            out2 = build(True)(x2, w1c, w2c)
        except Exception:
            # pipeline_mode=pl.Buffered(1) not supported on this JAX/libtpu combo:
            # fall back to the default pipeline (weights still fetched only once,
            # they just keep a second, unused buffer).
            out2 = build(False)(x2, w1c, w2c)
    else:
        out2 = pl.pallas_call(
            _ffn_kernel_chunked,
            out_shape=jax.ShapeDtypeStruct((Mp, dim_p), out_dtype),
            grid_spec=pltpu.PrefetchScalarGridSpec(
                num_scalar_prefetch=0,
                grid=(gm, kt),
                in_specs=[
                    pl.BlockSpec((tm, dim_p), lambda i, k: (i, 0)),   # x row tile
                    pl.BlockSpec((dim_p, tk), lambda i, k: (0, k)),   # W1 hidden chunk
                    pl.BlockSpec((tk, dim_p), lambda i, k: (k, 0)),   # W2 hidden chunk
                ],
                out_specs=pl.BlockSpec((tm, dim_p), lambda i, k: (i, 0)),
                scratch_shapes=[pltpu.VMEM((tm, dim_p), jnp.float32)],
            ),
            compiler_params=pltpu.CompilerParams(
                dimension_semantics=("parallel", "arbitrary"),
                vmem_limit_bytes=vmem_limit_bytes),
            cost_estimate=cost,
        )(x2, w1c, w2c)

    return out2[:M, :dim].reshape(B, S, dim)


def _reference(x, w1, w2):
    h = x @ w1
    h = 0.5 * h * (1.0 + lax.erf(h / jnp.sqrt(2.0)))      # exact (erf) GELU
    return h @ w2


if __name__ == "__main__":
    # Small shapes consistent with an MLP-Mixer FeedForward: tokens (B, S, dim).
    B, S, dim, hidden = 2, 8, 32, 64

    key = jax.random.PRNGKey(0)
    kx, k1, k2 = jax.random.split(key, 3)

    x = jax.random.normal(kx, (B, S, dim), dtype=jnp.float32)
    # Deterministic synthetic parameters (fc1: dim->hidden, fc2: hidden->dim, bias=False).
    w1 = jax.random.normal(k1, (dim, hidden), dtype=jnp.float32) * (1.0 / jnp.sqrt(dim))
    w2 = jax.random.normal(k2, (hidden, dim), dtype=jnp.float32) * (1.0 / jnp.sqrt(hidden))
    ref = _reference(x, w1, w2)

    # 1) Exact f32 path (weights resident, kt == 1).
    out = jax.block_until_ready(feed_forward(x, w1, w2))
    assert out.shape == (B, S, dim)
    assert jnp.allclose(out, ref, atol=1e-5, rtol=1e-5), "f32 resident path mismatch"

    # 2) Hidden-chunked accumulator path (kt > 1), forced small tiles.
    hidden2 = 256
    w1b = jax.random.normal(k1, (dim, hidden2), dtype=jnp.float32) * (1.0 / jnp.sqrt(dim))
    w2b = jax.random.normal(k2, (hidden2, dim), dtype=jnp.float32) * (1.0 / jnp.sqrt(hidden2))
    out2 = jax.block_until_ready(feed_forward(x, w1b, w2b, tm=16, tk=128))
    assert jnp.allclose(out2, _reference(x, w1b, w2b), atol=1e-5, rtol=1e-5), \
        "f32 chunked path mismatch"

    # 3) bf16-MXU-operand path (approximate by design; looser tolerance).
    out3 = jax.block_until_ready(feed_forward(x, w1, w2, mxu_dtype=jnp.bfloat16))
    assert jnp.allclose(out3, ref, atol=1e-1, rtol=1e-1), "bf16 path mismatch"

    print("KERNEL_OK")
</pallas_src>

<mosaic_0001>
module attributes {stable_mosaic.version = 11 : i64} {
  func.func @_ffn_kernel_resident(%arg0: i32, %arg1: memref<16x128xf32, #tpu.memory_space<vmem>>, %arg2: memref<128x128xf32, #tpu.memory_space<vmem>>, %arg3: memref<128x128xf32, #tpu.memory_space<vmem>>, %arg4: memref<16x128xf32, #tpu.memory_space<vmem>>) attributes {dimension_semantics = [#tpu.dimension_semantics<parallel>], iteration_bounds = array<i64: 1>, scalar_prefetch = 0 : i64, scratch_operands = 0 : i64, tpu.core_type = #tpu.core_type<tc>, window_params = [{transform_indices = @transform_0, window_bounds = array<i64: 16, 128>}, {pipeline_mode = #tpu.pipeline_mode<synchronous>, transform_indices = @transform_1, window_bounds = array<i64: 128, 128>}, {pipeline_mode = #tpu.pipeline_mode<synchronous>, transform_indices = @transform_2, window_bounds = array<i64: 128, 128>}, {transform_indices = @transform_3, window_bounds = array<i64: 16, 128>}]} {
    %c0 = arith.constant 0 : index
    %c0_0 = arith.constant 0 : index
    %0 = vector.load %arg1[%c0, %c0_0] : memref<16x128xf32, #tpu.memory_space<vmem>>, vector<16x128xf32>
    %c0_1 = arith.constant 0 : index
    %c0_2 = arith.constant 0 : index
    %1 = vector.load %arg2[%c0_1, %c0_2] : memref<128x128xf32, #tpu.memory_space<vmem>>, vector<128x128xf32>
    %cst = arith.constant dense<0.000000e+00> : vector<16x128xf32>
    %2 = tpu.matmul %0, %1, %cst {dimension_numbers = #tpu.dot_dimension_numbers<[1], [0], [0], [1], [0, 0, 1, 1], [], []>} : vector<16x128xf32>, vector<128x128xf32>, vector<16x128xf32> -> vector<16x128xf32>
    %cst_3 = arith.constant 5.000000e-01 : f32
    %3 = vector.broadcast %cst_3 : f32 to vector<16x128xf32>
    %4 = arith.mulf %3, %2 : vector<16x128xf32>
    %cst_4 = arith.constant 0.707106769 : f32
    %5 = vector.broadcast %cst_4 : f32 to vector<16x128xf32>
    %6 = arith.mulf %2, %5 : vector<16x128xf32>
    %7 = math.erf %6 : vector<16x128xf32>
    %8 = arith.mulf %4, %7 : vector<16x128xf32>
    %9 = arith.addf %4, %8 : vector<16x128xf32>
    %c0_5 = arith.constant 0 : index
    %c0_6 = arith.constant 0 : index
    %10 = vector.load %arg3[%c0_5, %c0_6] : memref<128x128xf32, #tpu.memory_space<vmem>>, vector<128x128xf32>
    %cst_7 = arith.constant dense<0.000000e+00> : vector<16x128xf32>
    %11 = tpu.matmul %9, %10, %cst_7 {dimension_numbers = #tpu.dot_dimension_numbers<[1], [0], [0], [1], [0, 0, 1, 1], [], []>} : vector<16x128xf32>, vector<128x128xf32>, vector<16x128xf32> -> vector<16x128xf32>
    %c0_8 = arith.constant 0 : index
    %c0_9 = arith.constant 0 : index
    %12 = vector.load %arg4[%c0_8, %c0_9] : memref<16x128xf32, #tpu.memory_space<vmem>>, vector<16x128xf32>
    tpu.vector_store %arg4[%c0_8, %c0_9], %11 {strides = array<i32>} : memref<16x128xf32, #tpu.memory_space<vmem>>, vector<16x128xf32>,
    return
  }
  func.func @transform_0(%arg0: i32) -> (i32, i32) {
    %c0_i32 = arith.constant 0 : i32
    %c0_i32_0 = arith.constant 0 : i32
    return %arg0, %c0_i32 : i32, i32
  }
  func.func @transform_1(%arg0: i32) -> (i32, i32) {
    %c0_i32 = arith.constant 0 : i32
    %c0_i32_0 = arith.constant 0 : i32
    %c0_i32_1 = arith.constant 0 : i32
    return %c0_i32, %c0_i32_0 : i32, i32
  }
  func.func @transform_2(%arg0: i32) -> (i32, i32) {
    %c0_i32 = arith.constant 0 : i32
    %c0_i32_0 = arith.constant 0 : i32
    %c0_i32_1 = arith.constant 0 : i32
    return %c0_i32, %c0_i32_0 : i32, i32
  }
  func.func @transform_3(%arg0: i32) -> (i32, i32) {
    %c0_i32 = arith.constant 0 : i32
    %c0_i32_0 = arith.constant 0 : i32
    return %arg0, %c0_i32 : i32, i32
  }
}

module attributes {stable_mosaic.version = 11 : i64} {
  func.func @_ffn_kernel_resident(%arg0: i32, %arg1: memref<16x128xf32, #tpu.memory_space<vmem>>, %arg2: memref<128x128xf32, #tpu.memory_space<vmem>>, %arg3: memref<128x128xf32, #tpu.memory_space<vmem>>, %arg4: memref<16x128xf32, #tpu.memory_space<vmem>>) attributes {dimension_semantics = [#tpu.dimension_semantics<parallel>], iteration_bounds = array<i64: 1>, scalar_prefetch = 0 : i64, scratch_operands = 0 : i64, tpu.core_type = #tpu.core_type<tc>, window_params = [{transform_indices = @transform_0, window_bounds = array<i64: 16, 128>}, {pipeline_mode = #tpu.pipeline_mode<synchronous>, transform_indices = @transform_1, window_bounds = array<i64: 128, 128>}, {pipeline_mode = #tpu.pipeline_mode<synchronous>, transform_indices = @transform_2, window_bounds = array<i64: 128, 128>}, {transform_indices = @transform_3, window_bounds = array<i64: 16, 128>}]} {
    %c0 = arith.constant 0 : index
    %c0_0 = arith.constant 0 : index
    %0 = vector.load %arg1[%c0, %c0_0] : memref<16x128xf32, #tpu.memory_space<vmem>>, vector<16x128xf32>
    %c0_1 = arith.constant 0 : index
    %c0_2 = arith.constant 0 : index
    %1 = vector.load %arg2[%c0_1, %c0_2] : memref<128x128xf32, #tpu.memory_space<vmem>>, vector<128x128xf32>
    %cst = arith.constant dense<0.000000e+00> : vector<16x128xf32>
    %2 = tpu.matmul %0, %1, %cst {dimension_numbers = #tpu.dot_dimension_numbers<[1], [0], [0], [1], [0, 0, 1, 1], [], []>} : vector<16x128xf32>, vector<128x128xf32>, vector<16x128xf32> -> vector<16x128xf32>
    %cst_3 = arith.constant 5.000000e-01 : f32
    %3 = vector.broadcast %cst_3 : f32 to vector<16x128xf32>
    %4 = arith.mulf %3, %2 : vector<16x128xf32>
    %cst_4 = arith.constant 0.707106769 : f32
    %5 = vector.broadcast %cst_4 : f32 to vector<16x128xf32>
    %6 = arith.mulf %2, %5 : vector<16x128xf32>
    %7 = math.erf %6 : vector<16x128xf32>
    %8 = arith.mulf %4, %7 : vector<16x128xf32>
    %9 = arith.addf %4, %8 : vector<16x128xf32>
    %c0_5 = arith.constant 0 : index
    %c0_6 = arith.constant 0 : index
    %10 = vector.load %arg3[%c0_5, %c0_6] : memref<128x128xf32, #tpu.memory_space<vmem>>, vector<128x128xf32>
    %cst_7 = arith.constant dense<0.000000e+00> : vector<16x128xf32>
    %11 = tpu.matmul %9, %10, %cst_7 {dimension_numbers = #tpu.dot_dimension_numbers<[1], [0], [0], [1], [0, 0, 1, 1], [], []>} : vector<16x128xf32>, vector<128x128xf32>, vector<16x128xf32> -> vector<16x128xf32>
    %c0_8 = arith.constant 0 : index
    %c0_9 = arith.constant 0 : index
    %12 = vector.load %arg4[%c0_8, %c0_9] : memref<16x128xf32, #tpu.memory_space<vmem>>, vector<16x128xf32>
    tpu.vector_store %arg4[%c0_8, %c0_9], %11 {strides = array<i32>} : memref<16x128xf32, #tpu.memory_space<vmem>>, vector<16x128xf32>,
    return
  }
  func.func @transform_0(%arg0: i32) -> (i32, i32) {
    %c0_i32 = arith.constant 0 : i32
    %c0_i32_0 = arith.constant 0 : i32
    return %arg0, %c0_i32 : i32, i32
  }
  func.func @transform_1(%arg0: i32) -> (i32, i32) {
    %c0_i32 = arith.constant 0 : i32
    %c0_i32_0 = arith.constant 0 : i32
    %c0_i32_1 = arith.constant 0 : i32
    return %c0_i32, %c0_i32_0 : i32, i32
  }
  func.func @transform_2(%arg0: i32) -> (i32, i32) {
    %c0_i32 = arith.constant 0 : i32
    %c0_i32_0 = arith.constant 0 : i32
    %c0_i32_1 = arith.constant 0 : i32
    return %c0_i32, %c0_i32_0 : i32, i32
  }
  func.func @transform_3(%arg0: i32) -> (i32, i32) {
    %c0_i32 = arith.constant 0 : i32
    %c0_i32_0 = arith.constant 0 : i32
    return %arg0, %c0_i32 : i32, i32
  }
}

</mosaic_0001>

<bundles_post_ra>
// kernel: tpu_custom_call.1
= control target key start
LH: loop header
LB: loop body
LE: loop exit
PB: predicated region body
PF: predicated region fallthrough
CT: control target
= control target key end

     0   :  { %8 = vsyncpa [#allocation3], 0  ;;  %s637_s0 = inlined_call_operand.hbm [shape: f32[16,128], index: 0, kind: input, shape index: {}]   ;;  %s638_s1 = inlined_call_operand.hbm [shape: f32[128,128], index: 1, kind: input, shape index: {}]   ;;  %s639_s2 = inlined_call_operand.hbm [shape: f32[128,128], index: 2, kind: input, shape index: {}]   ;;  %s640_s3 = inlined_call_operand.hbm [shape: f32[16,128], index: 3, kind: output, shape index: {}]  }
   0x1   :  { %9 = vsyncpa [#allocation6], 0 }
   0x2   :  { %10 = vsyncpa [#allocation4], 0  ;;  %s544_s12 = smov [#allocation5]   ;;  %s545_s14 = smov [#allocation2]  }
   0x3   :  { %s28_s13 = sshll.u32 %s544_s12, 4  ;;  %s16_s15 = sshll.u32 %s545_s14, 4  ;;  %s29_s13 = int_to_ptr.vmem [resolvable:$true] %s28_s13  ;;  %s570_s15 = int_to_ptr.vmem [resolvable:$true] %s16_s15 }
   0x4   :  { %s450_s18 = scalar_lea.hbm %s638_s1, 2048 }
   0x5   :  { %p451_p0 = scmp.ne.s32.totalorder %s638_s1, %s450_s18  ;;  %p454_p1 = scmp.lt.u32.totalorder %s450_s18, %s638_s1 }
   0x7   :  { %p456_p2 = pnand %p454_p1, %p451_p0 }
   0x9   :  { %459 = shalt.err (!%p456_p2)
}
   0xa   :  { %s460_s23 = scalar_lea.vmem %s29_s13, 2048  ;;  %p465_p4 = scmp.lt.s32.totalorder %s29_s13, %s29_s13 }
   0xb   :  { %p461_p3 = scmp.ne.s32.totalorder %s29_s13, %s460_s23  ;;  %p466_p5 = scmp.lt.s32.totalorder %s460_s23, %s460_s23 }
   0xd   :  { %p467_p6 = por %p466_p5, %p465_p4 }
   0xf   :  { %p468_p7 = pnand %p467_p6, %p461_p3 }
  0x11   :  { %471 = shalt.err (!%p468_p7)
}
  0x12   :  { %s546_s24 = smov 128   ;;  %s547_s25 = smov 8  }
  0x13   :  { %34 = dma.hbm_to_vmem [thread:$0]  %s638_s1, 2048, %s29_s13, [#allocation6], %s546_s24, %s546_s24, %s547_s25  }
  0x14   :  { %s472_s30 = scalar_lea.hbm %s637_s0, 256 }
  0x15   :  { %p473_p8 = scmp.ne.s32.totalorder %s637_s0, %s472_s30  ;;  %p476_p9 = scmp.lt.u32.totalorder %s472_s30, %s637_s0 }
  0x17   :  { %p478_p10 = pnand %p476_p9, %p473_p8 }
  0x19   :  { %481 = shalt.err (!%p478_p10)
}
  0x1a   :  { %s482_s8 = scalar_lea.vmem %s570_s15, 256  ;;  %p487_p12 = scmp.lt.s32.totalorder %s570_s15, %s570_s15 }
  0x1b   :  { %p483_p11 = scmp.ne.s32.totalorder %s570_s15, %s482_s8  ;;  %p488_p13 = scmp.lt.s32.totalorder %s482_s8, %s482_s8 }
  0x1d   :  { %p489_p0 = por %p488_p13, %p487_p12 }
  0x1f   :  { %p490_p1 = pnand %p489_p0, %p483_p11 }
  0x21   :  { %493 = shalt.err (!%p490_p1)
}
  0x22   :  { %22 = dma.hbm_to_vmem [thread:$0]  %s637_s0, 256, %s570_s15, [#allocation3], %s546_s24, %s546_s24, %s547_s25  }
  0x23   :  { %s548_s10 = smov [#allocation7]   ;;  %s494_s14 = scalar_lea.hbm %s639_s2, 2048 }
  0x24   :  { %s40_s11 = sshll.u32 %s548_s10, 4  ;;  %p495_p2 = scmp.ne.s32.totalorder %s639_s2, %s494_s14  ;;  %s41_s11 = int_to_ptr.vmem [resolvable:$true] %s40_s11 }
  0x25   :  { %p498_p3 = scmp.lt.u32.totalorder %s494_s14, %s639_s2 }
  0x27   :  { %p500_p4 = pnand %p498_p3, %p495_p2 }
  0x29   :  { %503 = shalt.err (!%p500_p4)
}
  0x2a   :  { %s504_s20 = scalar_lea.vmem %s41_s11, 2048  ;;  %p509_p6 = scmp.lt.s32.totalorder %s41_s11, %s41_s11 }
  0x2b   :  { %p505_p5 = scmp.ne.s32.totalorder %s41_s11, %s504_s20  ;;  %p510_p7 = scmp.lt.s32.totalorder %s504_s20, %s504_s20 }
  0x2d   :  { %p511_p8 = por %p510_p7, %p509_p6 }
  0x2f   :  { %p512_p9 = pnand %p511_p8, %p505_p5 }
  0x31   :  { %515 = shalt.err (!%p512_p9)
}
  0x32   :  { %46 = dma.hbm_to_vmem [thread:$0]  %s639_s2, 2048, %s41_s11, [#allocation6], %s546_s24, %s546_s24, %s547_s25  }
  0x33   :  { %538 = dma.done.wait [#allocation3], 256  }
  0x34   :  { %539 = vsyncadd [#allocation3], 4294967040 }
  0x35   :  { %540 = dma.done.wait [#allocation6], 4096  }
  0x36   :  { %541 = vsyncadd [#allocation6], 4294963200  ;;  %v58_v0 = vld [vmem:[#allocation5] sm:$0xff]  ;;  %v59_v1 = vld [vmem:[#allocation5 + $0x8] sm:$0xff]  ;;  %s549_s2 = smov [#allocation8]  }
  0x37   :  { %v60_v2 = vld [vmem:[#allocation5 + $0x10] sm:$0xff]  ;;  %v376_v3 = vpack.c.bf16 %v59_v1, %v58_v0  ;;  %v61_v4 = vld [vmem:[#allocation5 + $0x18] sm:$0xff]  ;;  %v62_v6 = vld [vmem:[#allocation5 + $0x20] sm:$0xff]  ;;  %s257_s21 = sshll.u32 %s549_s2, 4  ;;  %s258_s21 = int_to_ptr.vmem [resolvable:$true] %s257_s21 }
  0x38   :  { %v380_v5 = vpack.c.bf16 %v61_v4, %v60_v2  ;;  %v63_v7 = vld [vmem:[#allocation5 + $0x28] sm:$0xff]  ;;  %v64_v9 = vld [vmem:[#allocation5 + $0x30] sm:$0xff]  ;;  %v65_v10 = vld [vmem:[#allocation5 + $0x38] sm:$0xff]  ;;  %s516_s22 = scalar_lea.vmem %s258_s21, 256  ;;  %p521_p11 = scmp.lt.s32.totalorder %s258_s21, %s258_s21 }
  0x39   :  { %377 = vmatprep.subr.bf16.mxu0 %v376_v3  ;;  %v384_v8 = vpack.c.bf16 %v63_v7, %v62_v6  ;;  %v56_v11 = vld [vmem:[#allocation2] sm:$0xff]  ;;  %v159_v12 = vld [vmem:[#allocation7] sm:$0xff]  ;;  %v160_v13 = vld [vmem:[#allocation7 + $0x8] sm:$0xff]  ;;  %v388_v20 = vpack.c.bf16 %v65_v10, %v64_v9  ;;  %p517_p10 = scmp.ne.s32.totalorder %s258_s21, %s516_s22  ;;  %p522_p12 = scmp.lt.s32.totalorder %s516_s22, %s516_s22 }
  0x3a   :  { %379 = vmatpush3.bf16.msra.mxu0 %v376_v3  ;;  %338 = vmatprep.mubr.f32.mxu0 %v56_v11  ;;  %v161_v14 = vld [vmem:[#allocation7 + $0x10] sm:$0xff]  ;;  %v408_v15 = vpack.c.bf16 %v160_v13, %v159_v12  ;;  %v162_v16 = vld [vmem:[#allocation7 + $0x18] sm:$0xff]  ;;  %v163_v18 = vld [vmem:[#allocation7 + $0x20] sm:$0xff] }
  0x3b   :  { %381 = vmatprep.subr.bf16.mxu0 %v380_v5  ;;  %v412_v17 = vpack.c.bf16 %v162_v16, %v161_v14  ;;  %v164_v19 = vld [vmem:[#allocation7 + $0x28] sm:$0xff]  ;;  %v66_v21 = vld [vmem:[#allocation5 + $0x40] sm:$0xff]  ;;  %v68_v25 = vld [vmem:[#allocation5 + $0x50] sm:$0xff]  ;;  %p523_p13 = por %p522_p12, %p521_p11 }
  0x3c   :  { %409 = vmatprep.subr.bf16.mxu1 %v408_v15  ;;  %v67_v22 = vld [vmem:[#allocation5 + $0x48] sm:$0xff]  ;;  %v416_v23 = vpack.c.bf16 %v164_v19, %v163_v18  ;;  %v69_v26 = vld [vmem:[#allocation5 + $0x58] sm:$0xff]  ;;  %v70_v28 = vld [vmem:[#allocation5 + $0x60] sm:$0xff] }
  0x3d   :  { %411 = vmatpush3.bf16.msra.mxu1 %v408_v15  ;;  %v392_v24 = vpack.c.bf16 %v67_v22, %v66_v21  ;;  %v396_v27 = vpack.c.bf16 %v69_v26, %v68_v25  ;;  %v71_v29 = vld [vmem:[#allocation5 + $0x68] sm:$0xff]  ;;  %v72_v31 = vld [vmem:[#allocation5 + $0x70] sm:$0xff]  ;;  %v73_v32 = vld [vmem:[#allocation5 + $0x78] sm:$0xff]  ;;  %p524_p0 = pnand %p523_p13, %p517_p10 }
  0x3e   :  { %383 = vmatpush3.bf16.msra.mxu0 %v380_v5  ;;  %413 = vmatprep.subr.bf16.mxu1 %v412_v17  ;;  %v400_v30 = vpack.c.bf16 %v71_v29, %v70_v28  ;;  %v404_v33 = vpack.c.bf16 %v73_v32, %v72_v31  ;;  %v57_v34 = vld [vmem:[#allocation2 + $0x8] sm:$0xff]  ;;  %v165_v35 = vld [vmem:[#allocation7 + $0x30] sm:$0xff]  ;;  %v167_v38 = vld [vmem:[#allocation7 + $0x40] sm:$0xff] }
  0x3f   :  { %385 = vmatprep.subr.bf16.mxu0 %v384_v8  ;;  %v166_v36 = vld [vmem:[#allocation7 + $0x38] sm:$0xff]  ;;  %v168_v39 = vld [vmem:[#allocation7 + $0x48] sm:$0xff]  ;;  %v169_v41 = vld [vmem:[#allocation7 + $0x50] sm:$0xff] }
  0x40   :  { %v420_v37 = vpack.c.bf16 %v166_v36, %v165_v35  ;;  %v424_v40 = vpack.c.bf16 %v168_v39, %v167_v38  ;;  %v170_v42 = vld [vmem:[#allocation7 + $0x58] sm:$0xff]  ;;  %v171_v44 = vld [vmem:[#allocation7 + $0x60] sm:$0xff]  ;;  %v172_v45 = vld [vmem:[#allocation7 + $0x68] sm:$0xff] }
  0x41   :  { %415 = vmatpush3.bf16.msra.mxu1 %v412_v17  ;;  %v428_v43 = vpack.c.bf16 %v170_v42, %v169_v41  ;;  %v432_v46 = vpack.c.bf16 %v172_v45, %v171_v44  ;;  %v173_v47 = vld [vmem:[#allocation7 + $0x70] sm:$0xff]  ;;  %v174_v48 = vld [vmem:[#allocation7 + $0x78] sm:$0xff] }
  0x42   :  { %387 = vmatpush3.bf16.msra.mxu0 %v384_v8  ;;  %417 = vmatprep.subr.bf16.mxu1 %v416_v23  ;;  %v436_v49 = vpack.c.bf16 %v174_v48, %v173_v47 }
  0x43   :  { %389 = vmatprep.subr.bf16.mxu0 %v388_v20 }
  0x45   :  { %419 = vmatpush3.bf16.msra.mxu1 %v416_v23 }
  0x46   :  { %391 = vmatpush3.bf16.msra.mxu0 %v388_v20  ;;  %421 = vmatprep.subr.bf16.mxu1 %v420_v37 }
  0x47   :  { %393 = vmatprep.subr.bf16.mxu0 %v392_v24 }
  0x49   :  { %423 = vmatpush3.bf16.msra.mxu1 %v420_v37 }
  0x4a   :  { %395 = vmatpush3.bf16.msra.mxu0 %v392_v24  ;;  %425 = vmatprep.subr.bf16.mxu1 %v424_v40 }
  0x4b   :  { %397 = vmatprep.subr.bf16.mxu0 %v396_v27 }
  0x4d   :  { %427 = vmatpush3.bf16.msra.mxu1 %v424_v40 }
  0x4e   :  { %399 = vmatpush3.bf16.msra.mxu0 %v396_v27  ;;  %429 = vmatprep.subr.bf16.mxu1 %v428_v43 }
  0x4f   :  { %401 = vmatprep.subr.bf16.mxu0 %v400_v30 }
  0x51   :  { %431 = vmatpush3.bf16.msra.mxu1 %v428_v43 }
  0x52   :  { %403 = vmatpush3.bf16.msra.mxu0 %v400_v30  ;;  %433 = vmatprep.subr.bf16.mxu1 %v432_v46 }
  0x53   :  { %405 = vmatprep.subr.bf16.mxu0 %v404_v33 }
  0x55   :  { %435 = vmatpush3.bf16.msra.mxu1 %v432_v46 }
  0x56   :  { %407 = vmatpush3.bf16.msra.mxu0 %v404_v33  ;;  %437 = vmatprep.subr.bf16.mxu1 %v436_v49 }
  0x59   :  { %339 = vmatmul.mubr.f32.vlgmr.msra.gmra.mrb[0].mxu0 %v57_v34  ;;  %439 = vmatpush3.bf16.msra.mxu1 %v436_v49 }
 0x12c   :  { %v340_v50 = vpop.f32.mrb[0].mxu0 }
 0x12d   :  { %v152_v51 = vmul.f32 0.70710677, %v340_v50  ;;  %v140_v52 = vpop.f32.mrb[1].mxu0  ;;  %v150_v54 = vmul.f32 0.5, %v340_v50 }
 0x12e   :  { %v151_v53 = vmul.f32 0.70710677, %v140_v52  ;;  %v149_v56 = vmul.f32 0.5, %v140_v52 }
 0x12f   :  { %446 = verf.f32 %v152_v51 }
 0x130   :  { %448 = verf.f32 %v151_v53 }
 0x139   :  { %v447_v55 = vpop.eup %446 }
 0x13a   :  { %v449_v57 = vpop.eup %448  ;;  %v156_v58 = vmul.f32 %v447_v55, %v150_v54 }
 0x13b   :  { %v155_v59 = vmul.f32 %v449_v57, %v149_v56 }
 0x13c   :  { %v158_v61 = vadd.f32 %v156_v58, %v150_v54 }
 0x13d   :  { %v157_v60 = vadd.f32 %v155_v59, %v149_v56 }
 0x13f   :  { %373 = vmatprep.mubr.f32.mxu1 %v157_v60 }
 0x140   :  { %374 = vmatmul.mubr.f32.vlgmr.msra.gmra.mrb[0].mxu1 %v158_v61 }
 0x213   :  { %v375_v62 = vpop.f32.mrb[0].mxu1 }
 0x214   :  { %251 = vst [vmem:[#allocation8 + $0x8] sm:$0xff] %v375_v62  ;;  %v241_v63 = vpop.f32.mrb[1].mxu1 }
 0x215   :  { %250 = vst [vmem:[#allocation8] sm:$0xff] %v241_v63 }
 0x216   :  { %527 = shalt.err (!%p524_p0)
}
 0x217   :  { %s528_s27 = scalar_lea.hbm %s640_s3, 256 }
 0x218   :  { %p529_p1 = scmp.ne.s32.totalorder %s640_s3, %s528_s27  ;;  %p532_p2 = scmp.lt.u32.totalorder %s528_s27, %s640_s3 }
 0x21a   :  { %p534_p3 = pnand %p532_p2, %p529_p1 }
 0x21c   :  { %537 = shalt.err (!%p534_p3)
}
 0x21d   :  { %263 = dma.vmem_to_hbm [thread:$0]  %s258_s21, 256, %s640_s3, [#allocation4], %s546_s24, %s546_s24, %s547_s25  }
 0x21e   :  { %542 = dma.done.wait [#allocation4], 256  }
 0x21f   :  { %543 = vsyncadd [#allocation4], 4294967040 }
 0x220   :  { %267 = vsyncpa [#allocation3], 1 }
 0x221   :  { %268 = vsyncpa [#allocation6], 1 }
 0x222   :  { %269 = vsyncpa [#allocation4], 1 }

// kernel: tpu_custom_call.1
= control target key start
LH: loop header
LB: loop body
LE: loop exit
PB: predicated region body
PF: predicated region fallthrough
CT: control target
= control target key end

     0   :  { %8 = vsyncpa [#allocation3], 0  ;;  %s637_s0 = inlined_call_operand.hbm [shape: f32[16,128], index: 0, kind: input, shape index: {}]   ;;  %s638_s1 = inlined_call_operand.hbm [shape: f32[128,128], index: 1, kind: input, shape index: {}]   ;;  %s639_s2 = inlined_call_operand.hbm [shape: f32[128,128], index: 2, kind: input, shape index: {}]   ;;  %s640_s3 = inlined_call_operand.hbm [shape: f32[16,128], index: 3, kind: output, shape index: {}]  }
   0x1   :  { %9 = vsyncpa [#allocation6], 0 }
   0x2   :  { %10 = vsyncpa [#allocation4], 0  ;;  %s544_s12 = smov [#allocation5]   ;;  %s545_s14 = smov [#allocation2]  }
   0x3   :  { %s28_s13 = sshll.u32 %s544_s12, 4  ;;  %s16_s15 = sshll.u32 %s545_s14, 4  ;;  %s29_s13 = int_to_ptr.vmem [resolvable:$true] %s28_s13  ;;  %s570_s15 = int_to_ptr.vmem [resolvable:$true] %s16_s15 }
   0x4   :  { %s450_s18 = scalar_lea.hbm %s638_s1, 2048 }
   0x5   :  { %p451_p0 = scmp.ne.s32.totalorder %s638_s1, %s450_s18  ;;  %p454_p1 = scmp.lt.u32.totalorder %s450_s18, %s638_s1 }
   0x7   :  { %p456_p2 = pnand %p454_p1, %p451_p0 }
   0x9   :  { %459 = shalt.err (!%p456_p2)
}
   0xa   :  { %s460_s23 = scalar_lea.vmem %s29_s13, 2048  ;;  %p465_p4 = scmp.lt.s32.totalorder %s29_s13, %s29_s13 }
   0xb   :  { %p461_p3 = scmp.ne.s32.totalorder %s29_s13, %s460_s23  ;;  %p466_p5 = scmp.lt.s32.totalorder %s460_s23, %s460_s23 }
   0xd   :  { %p467_p6 = por %p466_p5, %p465_p4 }
   0xf   :  { %p468_p7 = pnand %p467_p6, %p461_p3 }
  0x11   :  { %471 = shalt.err (!%p468_p7)
}
  0x12   :  { %s546_s24 = smov 128   ;;  %s547_s25 = smov 8  }
  0x13   :  { %34 = dma.hbm_to_vmem [thread:$0]  %s638_s1, 2048, %s29_s13, [#allocation6], %s546_s24, %s546_s24, %s547_s25  }
  0x14   :  { %s472_s30 = scalar_lea.hbm %s637_s0, 256 }
  0x15   :  { %p473_p8 = scmp.ne.s32.totalorder %s637_s0, %s472_s30  ;;  %p476_p9 = scmp.lt.u32.totalorder %s472_s30, %s637_s0 }
  0x17   :  { %p478_p10 = pnand %p476_p9, %p473_p8 }
  0x19   :  { %481 = shalt.err (!%p478_p10)
}
  0x1a   :  { %s482_s8 = scalar_lea.vmem %s570_s15, 256  ;;  %p487_p12 = scmp.lt.s32.totalorder %s570_s15, %s570_s15 }
  0x1b   :  { %p483_p11 = scmp.ne.s32.totalorder %s570_s15, %s482_s8  ;;  %p488_p13 = scmp.lt.s32.totalorder %s482_s8, %s482_s8 }
  0x1d   :  { %p489_p0 = por %p488_p13, %p487_p12 }
  0x1f   :  { %p490_p1 = pnand %p489_p0, %p483_p11 }
  0x21   :  { %493 = shalt.err (!%p490_p1)
}
  0x22   :  { %22 = dma.hbm_to_vmem [thread:$0]  %s637_s0, 256, %s570_s15, [#allocation3], %s546_s24, %s546_s24, %s547_s25  }
  0x23   :  { %s548_s10 = smov [#allocation7]   ;;  %s494_s14 = scalar_lea.hbm %s639_s2, 2048 }
  0x24   :  { %s40_s11 = sshll.u32 %s548_s10, 4  ;;  %p495_p2 = scmp.ne.s32.totalorder %s639_s2, %s494_s14  ;;  %s41_s11 = int_to_ptr.vmem [resolvable:$true] %s40_s11 }
  0x25   :  { %p498_p3 = scmp.lt.u32.totalorder %s494_s14, %s639_s2 }
  0x27   :  { %p500_p4 = pnand %p498_p3, %p495_p2 }
  0x29   :  { %503 = shalt.err (!%p500_p4)
}
  0x2a   :  { %s504_s20 = scalar_lea.vmem %s41_s11, 2048  ;;  %p509_p6 = scmp.lt.s32.totalorder %s41_s11, %s41_s11 }
  0x2b   :  { %p505_p5 = scmp.ne.s32.totalorder %s41_s11, %s504_s20  ;;  %p510_p7 = scmp.lt.s32.totalorder %s504_s20, %s504_s20 }
  0x2d   :  { %p511_p8 = por %p510_p7, %p509_p6 }
  0x2f   :  { %p512_p9 = pnand %p511_p8, %p505_p5 }
  0x31   :  { %515 = shalt.err (!%p512_p9)
}
  0x32   :  { %46 = dma.hbm_to_vmem [thread:$0]  %s639_s2, 2048, %s41_s11, [#allocation6], %s546_s24, %s546_s24, %s547_s25  }
  0x33   :  { %538 = dma.done.wait [#allocation3], 256  }
  0x34   :  { %539 = vsyncadd [#allocation3], 4294967040 }
  0x35   :  { %540 = dma.done.wait [#allocation6], 4096  }
  0x36   :  { %541 = vsyncadd [#allocation6], 4294963200  ;;  %v58_v0 = vld [vmem:[#allocation5] sm:$0xff]  ;;  %v59_v1 = vld [vmem:[#allocation5 + $0x8] sm:$0xff]  ;;  %s549_s2 = smov [#allocation8]  }
  0x37   :  { %v60_v2 = vld [vmem:[#allocation5 + $0x10] sm:$0xff]  ;;  %v376_v3 = vpack.c.bf16 %v59_v1, %v58_v0  ;;  %v61_v4 = vld [vmem:[#allocation5 + $0x18] sm:$0xff]  ;;  %v62_v6 = vld [vmem:[#allocation5 + $0x20] sm:$0xff]  ;;  %s257_s21 = sshll.u32 %s549_s2, 4  ;;  %s258_s21 = int_to_ptr.vmem [resolvable:$true] %s257_s21 }
  0x38   :  { %v380_v5 = vpack.c.bf16 %v61_v4, %v60_v2  ;;  %v63_v7 = vld [vmem:[#allocation5 + $0x28] sm:$0xff]  ;;  %v64_v9 = vld [vmem:[#allocation5 + $0x30] sm:$0xff]  ;;  %v65_v10 = vld [vmem:[#allocation5 + $0x38] sm:$0xff]  ;;  %s516_s22 = scalar_lea.vmem %s258_s21, 256  ;;  %p521_p11 = scmp.lt.s32.totalorder %s258_s21, %s258_s21 }
  0x39   :  { %377 = vmatprep.subr.bf16.mxu0 %v376_v3  ;;  %v384_v8 = vpack.c.bf16 %v63_v7, %v62_v6  ;;  %v56_v11 = vld [vmem:[#allocation2] sm:$0xff]  ;;  %v159_v12 = vld [vmem:[#allocation7] sm:$0xff]  ;;  %v160_v13 = vld [vmem:[#allocation7 + $0x8] sm:$0xff]  ;;  %v388_v20 = vpack.c.bf16 %v65_v10, %v64_v9  ;;  %p517_p10 = scmp.ne.s32.totalorder %s258_s21, %s516_s22  ;;  %p522_p12 = scmp.lt.s32.totalorder %s516_s22, %s516_s22 }
  0x3a   :  { %379 = vmatpush3.bf16.msra.mxu0 %v376_v3  ;;  %338 = vmatprep.mubr.f32.mxu0 %v56_v11  ;;  %v161_v14 = vld [vmem:[#allocation7 + $0x10] sm:$0xff]  ;;  %v408_v15 = vpack.c.bf16 %v160_v13, %v159_v12  ;;  %v162_v16 = vld [vmem:[#allocation7 + $0x18] sm:$0xff]  ;;  %v163_v18 = vld [vmem:[#allocation7 + $0x20] sm:$0xff] }
  0x3b   :  { %381 = vmatprep.subr.bf16.mxu0 %v380_v5  ;;  %v412_v17 = vpack.c.bf16 %v162_v16, %v161_v14  ;;  %v164_v19 = vld [vmem:[#allocation7 + $0x28] sm:$0xff]  ;;  %v66_v21 = vld [vmem:[#allocation5 + $0x40] sm:$0xff]  ;;  %v68_v25 = vld [vmem:[#allocation5 + $0x50] sm:$0xff]  ;;  %p523_p13 = por %p522_p12, %p521_p11 }
  0x3c   :  { %409 = vmatprep.subr.bf16.mxu1 %v408_v15  ;;  %v67_v22 = vld [vmem:[#allocation5 + $0x48] sm:$0xff]  ;;  %v416_v23 = vpack.c.bf16 %v164_v19, %v163_v18  ;;  %v69_v26 = vld [vmem:[#allocation5 + $0x58] sm:$0xff]  ;;  %v70_v28 = vld [vmem:[#allocation5 + $0x60] sm:$0xff] }
  0x3d   :  { %411 = vmatpush3.bf16.msra.mxu1 %v408_v15  ;;  %v392_v24 = vpack.c.bf16 %v67_v22, %v66_v21  ;;  %v396_v27 = vpack.c.bf16 %v69_v26, %v68_v25  ;;  %v71_v29 = vld [vmem:[#allocation5 + $0x68] sm:$0xff]  ;;  %v72_v31 = vld [vmem:[#allocation5 + $0x70] sm:$0xff]  ;;  %v73_v32 = vld [vmem:[#allocation5 + $0x78] sm:$0xff]  ;;  %p524_p0 = pnand %p523_p13, %p517_p10 }
  0x3e   :  { %383 = vmatpush3.bf16.msra.mxu0 %v380_v5  ;;  %413 = vmatprep.subr.bf16.mxu1 %v412_v17  ;;  %v400_v30 = vpack.c.bf16 %v71_v29, %v70_v28  ;;  %v404_v33 = vpack.c.bf16 %v73_v32, %v72_v31  ;;  %v57_v34 = vld [vmem:[#allocation2 + $0x8] sm:$0xff]  ;;  %v165_v35 = vld [vmem:[#allocation7 + $0x30] sm:$0xff]  ;;  %v167_v38 = vld [vmem:[#allocation7 + $0x40] sm:$0xff] }
  0x3f   :  { %385 = vmatprep.subr.bf16.mxu0 %v384_v8  ;;  %v166_v36 = vld [vmem:[#allocation7 + $0x38] sm:$0xff]  ;;  %v168_v39 = vld [vmem:[#allocation7 + $0x48] sm:$0xff]  ;;  %v169_v41 = vld [vmem:[#allocation7 + $0x50] sm:$0xff] }
  0x40   :  { %v420_v37 = vpack.c.bf16 %v166_v36, %v165_v35  ;;  %v424_v40 = vpack.c.bf16 %v168_v39, %v167_v38  ;;  %v170_v42 = vld [vmem:[#allocation7 + $0x58] sm:$0xff]  ;;  %v171_v44 = vld [vmem:[#allocation7 + $0x60] sm:$0xff]  ;;  %v172_v45 = vld [vmem:[#allocation7 + $0x68] sm:$0xff] }
  0x41   :  { %415 = vmatpush3.bf16.msra.mxu1 %v412_v17  ;;  %v428_v43 = vpack.c.bf16 %v170_v42, %v169_v41  ;;  %v432_v46 = vpack.c.bf16 %v172_v45, %v171_v44  ;;  %v173_v47 = vld [vmem:[#allocation7 + $0x70] sm:$0xff]  ;;  %v174_v48 = vld [vmem:[#allocation7 + $0x78] sm:$0xff] }
  0x42   :  { %387 = vmatpush3.bf16.msra.mxu0 %v384_v8  ;;  %417 = vmatprep.subr.bf16.mxu1 %v416_v23  ;;  %v436_v49 = vpack.c.bf16 %v174_v48, %v173_v47 }
  0x43   :  { %389 = vmatprep.subr.bf16.mxu0 %v388_v20 }
  0x45   :  { %419 = vmatpush3.bf16.msra.mxu1 %v416_v23 }
  0x46   :  { %391 = vmatpush3.bf16.msra.mxu0 %v388_v20  ;;  %421 = vmatprep.subr.bf16.mxu1 %v420_v37 }
  0x47   :  { %393 = vmatprep.subr.bf16.mxu0 %v392_v24 }
  0x49   :  { %423 = vmatpush3.bf16.msra.mxu1 %v420_v37 }
  0x4a   :  { %395 = vmatpush3.bf16.msra.mxu0 %v392_v24  ;;  %425 = vmatprep.subr.bf16.mxu1 %v424_v40 }
  0x4b   :  { %397 = vmatprep.subr.bf16.mxu0 %v396_v27 }
  0x4d   :  { %427 = vmatpush3.bf16.msra.mxu1 %v424_v40 }
  0x4e   :  { %399 = vmatpush3.bf16.msra.mxu0 %v396_v27  ;;  %429 = vmatprep.subr.bf16.mxu1 %v428_v43 }
  0x4f   :  { %401 = vmatprep.subr.bf16.mxu0 %v400_v30 }
  0x51   :  { %431 = vmatpush3.bf16.msra.mxu1 %v428_v43 }
  0x52   :  { %403 = vmatpush3.bf16.msra.mxu0 %v400_v30  ;;  %433 = vmatprep.subr.bf16.mxu1 %v432_v46 }
  0x53   :  { %405 = vmatprep.subr.bf16.mxu0 %v404_v33 }
  0x55   :  { %435 = vmatpush3.bf16.msra.mxu1 %v432_v46 }
  0x56   :  { %407 = vmatpush3.bf16.msra.mxu0 %v404_v33  ;;  %437 = vmatprep.subr.bf16.mxu1 %v436_v49 }
  0x59   :  { %339 = vmatmul.mubr.f32.vlgmr.msra.gmra.mrb[0].mxu0 %v57_v34  ;;  %439 = vmatpush3.bf16.msra.mxu1 %v436_v49 }
 0x12c   :  { %v340_v50 = vpop.f32.mrb[0].mxu0 }
 0x12d   :  { %v152_v51 = vmul.f32 0.70710677, %v340_v50  ;;  %v140_v52 = vpop.f32.mrb[1].mxu0  ;;  %v150_v54 = vmul.f32 0.5, %v340_v50 }
 0x12e   :  { %v151_v53 = vmul.f32 0.70710677, %v140_v52  ;;  %v149_v56 = vmul.f32 0.5, %v140_v52 }
 0x12f   :  { %446 = verf.f32 %v152_v51 }
 0x130   :  { %448 = verf.f32 %v151_v53 }
 0x139   :  { %v447_v55 = vpop.eup %446 }
 0x13a   :  { %v449_v57 = vpop.eup %448  ;;  %v156_v58 = vmul.f32 %v447_v55, %v150_v54 }
 0x13b   :  { %v155_v59 = vmul.f32 %v449_v57, %v149_v56 }
 0x13c   :  { %v158_v61 = vadd.f32 %v156_v58, %v150_v54 }
 0x13d   :  { %v157_v60 = vadd.f32 %v155_v59, %v149_v56 }
 0x13f   :  { %373 = vmatprep.mubr.f32.mxu1 %v157_v60 }
 0x140   :  { %374 = vmatmul.mubr.f32.vlgmr.msra.gmra.mrb[0].mxu1 %v158_v61 }
 0x213   :  { %v375_v62 = vpop.f32.mrb[0].mxu1 }
 0x214   :  { %251 = vst [vmem:[#allocation8 + $0x8] sm:$0xff] %v375_v62  ;;  %v241_v63 = vpop.f32.mrb[1].mxu1 }
 0x215   :  { %250 = vst [vmem:[#allocation8] sm:$0xff] %v241_v63 }
 0x216   :  { %527 = shalt.err (!%p524_p0)
}
 0x217   :  { %s528_s27 = scalar_lea.hbm %s640_s3, 256 }
 0x218   :  { %p529_p1 = scmp.ne.s32.totalorder %s640_s3, %s528_s27  ;;  %p532_p2 = scmp.lt.u32.totalorder %s528_s27, %s640_s3 }
 0x21a   :  { %p534_p3 = pnand %p532_p2, %p529_p1 }
 0x21c   :  { %537 = shalt.err (!%p534_p3)
}
 0x21d   :  { %263 = dma.vmem_to_hbm [thread:$0]  %s258_s21, 256, %s640_s3, [#allocation4], %s546_s24, %s546_s24, %s547_s25  }
 0x21e   :  { %542 = dma.done.wait [#allocation4], 256  }
 0x21f   :  { %543 = vsyncadd [#allocation4], 4294967040 }
 0x220   :  { %267 = vsyncpa [#allocation3], 1 }
 0x221   :  { %268 = vsyncpa [#allocation6], 1 }
 0x222   :  { %269 = vsyncpa [#allocation4], 1 }

</bundles_post_ra>
